<compile_context>
chip_gen: v7x
topology: tpu7x:2x2x1
jax: 0.10.0
libtpu: 0.0.40
codegen_flags: <defaults>
</compile_context>

<pallas_src>
import functools

import jax
import jax.numpy as jnp
from jax.experimental import pallas as pl
from jax.experimental.pallas import tpu as pltpu

KERNEL_SIZE = 3
DILATION = 1
PAD = (KERNEL_SIZE - 1) // 2 * DILATION
BN_EPS = 1e-5
LANE = 128


def _round_up(x, m):
    return (x + m - 1) // m * m


# ----------------------------- kernel helpers ------------------------------

def _fused_conv_bn(x, w, b, g, be, mask, inv_count):
    """Fused 3-tap Conv1d + training-mode BatchNorm1d on a (Cin, M) slab.

    x    : (Cin, M)    activations, zero at every padding lane
    w    : (Ot, 3*Cin) tap-major fused conv weights
    b,g,be: (Ot, 1)    conv bias / BN gamma / BN beta
    mask : (1, M)      1.0 at valid (non-padding) positions
    returns (Ot, M) float32 BN-normalized conv output (unmasked).
    """
    M = x.shape[-1]
    # Tap shifts on the XLU.  Per-sample zero padding absorbs the shift, so
    # there is no cross-sample leakage at valid positions; the global
    # wraparound lanes are padding lanes whose outputs are masked/discarded.
    x_m1 = pltpu.roll(x, shift=1, axis=1)        # x[p-1] at position p
    x_p1 = pltpu.roll(x, shift=M - 1, axis=1)    # x[p+1] at position p
    stacked = jnp.concatenate([x_m1, x, x_p1], axis=0)          # (3*Cin, M)

    # Single MXU matmul over the fused 3*Cin contraction dim.
    y = jnp.dot(w, stacked, preferred_element_type=jnp.float32) + b  # (Ot, M)

    # One-pass BN statistics over valid positions only (f32 accumulation).
    ym = y * mask
    s1 = jnp.sum(ym, axis=1, keepdims=True)
    s2 = jnp.sum(ym * ym, axis=1, keepdims=True)
    mean = s1 * inv_count
    var = s2 * inv_count - mean * mean           # biased variance (train mode)
    inv = jax.lax.rsqrt(var + BN_EPS)
    return (y - mean) * inv * g + be


def _conv_bn_relu_kernel(x_ref, w_ref, b_ref, g_ref, be_ref, m_ref, o_ref,
                         *, inv_count):
    """Pass 1:  y = relu(bn1(conv1(x))), re-zeroed at padding lanes."""
    mask = m_ref[...]
    yn = _fused_conv_bn(x_ref[...], w_ref[...], b_ref[...], g_ref[...],
                        be_ref[...], mask, inv_count)
    o_ref[...] = jnp.maximum(yn, 0.0) * mask


def _conv_bn_res_relu_kernel(y_ref, w_ref, b_ref, g_ref, be_ref, m_ref,
                             xres_ref, o_ref, *, inv_count):
    """Pass 2:  out = relu(x + bn2(conv2(y)))."""
    zn = _fused_conv_bn(y_ref[...], w_ref[...], b_ref[...], g_ref[...],
                        be_ref[...], m_ref[...], inv_count)
    o_ref[...] = jnp.maximum(xres_ref[...] + zn, 0.0)


# -------------------------------- wrapper -----------------------------------

def residual_block(x_ncl, params):
    """x_ncl: (N, C, L) float32 -> (N, C, L) float32."""
    w1, b1, g1, be1, w2, b2, g2, be2 = params
    N, C, L = x_ncl.shape
    f32 = jnp.float32

    # Lane-dense flat layout with per-sample conv padding baked in.
    LPS = _round_up(L + 2 * PAD, LANE)
    M = N * LPS
    inv_count = 1.0 / float(N * L)

    x_c = jnp.transpose(x_ncl, (1, 0, 2)).astype(f32)                # (C, N, L)
    x_flat = jnp.pad(x_c, ((0, 0), (0, 0),
                           (PAD, LPS - L - PAD))).reshape(C, M)      # (C, M)

    pos = jnp.arange(LPS, dtype=jnp.int32)
    valid = (pos >= PAD) & (pos < PAD + L)
    mask = jnp.tile(valid, (N,)).astype(f32).reshape(1, M)

    # Fused tap-major conv weights: (Cout, Cin, K) -> (Cout, K*Cin).
    wf1 = jnp.transpose(w1, (0, 2, 1)).reshape(C, KERNEL_SIZE * C).astype(f32)
    wf2 = jnp.transpose(w2, (0, 2, 1)).reshape(C, KERNEL_SIZE * C).astype(f32)
    col = lambda v: v.reshape(C, 1).astype(f32)

    # Cout tiling (exact for BN: stats are per-channel over the full N*L).
    # TODO(synk): for very large N*L, tiling M additionally would need a
    #             cross-tile BN reduction (two-phase stats); not needed here.
    TCO = min(C, 128) if C % 8 == 0 else C
    grid = (pl.cdiv(C, TCO),)

    x_spec = pl.BlockSpec((C, M), lambda i: (0, 0))                  # resident
    w_spec = pl.BlockSpec((TCO, KERNEL_SIZE * C), lambda i: (i, 0))
    c_spec = pl.BlockSpec((TCO, 1), lambda i: (i, 0))
    m_spec = pl.BlockSpec((1, M), lambda i: (0, 0))                  # resident
    o_spec = pl.BlockSpec((TCO, M), lambda i: (i, 0))

    cparams = pltpu.CompilerParams(dimension_semantics=("parallel",))

    # Pass 1: y = relu(bn1(conv1(x)))  (zero at padding lanes).
    y_flat = pl.pallas_call(
        functools.partial(_conv_bn_relu_kernel, inv_count=inv_count),
        out_shape=jax.ShapeDtypeStruct((C, M), f32),
        grid=grid,
        in_specs=[x_spec, w_spec, c_spec, c_spec, c_spec, m_spec],
        out_specs=o_spec,
        compiler_params=cparams,
    )(x_flat, wf1, col(b1), col(g1), col(be1), mask)

    # Pass 2: out = relu(x + bn2(conv2(y))).
    out_flat = pl.pallas_call(
        functools.partial(_conv_bn_res_relu_kernel, inv_count=inv_count),
        out_shape=jax.ShapeDtypeStruct((C, M), f32),
        grid=grid,
        in_specs=[x_spec, w_spec, c_spec, c_spec, c_spec, m_spec, o_spec],
        out_specs=o_spec,
        compiler_params=cparams,
    )(y_flat, wf2, col(b2), col(g2), col(be2), mask, x_flat)

    out = out_flat.reshape(C, N, LPS)[:, :, PAD:PAD + L]
    return jnp.transpose(out, (1, 0, 2))                             # (N, C, L)


# --------------------------- plain-JAX reference -----------------------------

def residual_block_reference(x, params):
    w1, b1, g1, be1, w2, b2, g2, be2 = params

    def conv(x, w, b):
        y = jax.lax.conv_general_dilated(
            x, w, window_strides=(1,), padding=[(PAD, PAD)],
            rhs_dilation=(DILATION,), dimension_numbers=('NCH', 'OIH', 'NCH'))
        return y + b[None, :, None]

    def bn(y, g, be):
        m = jnp.mean(y, axis=(0, 2), keepdims=True)
        v = jnp.mean((y - m) ** 2, axis=(0, 2), keepdims=True)
        return (y - m) * jax.lax.rsqrt(v + BN_EPS) * g[None, :, None] \
               + be[None, :, None]

    y = jax.nn.relu(bn(conv(x, w1, b1), g1, be1))
    y = bn(conv(y, w2, b2), g2, be2)
    return jax.nn.relu(x + y)


# ---------------------------------- main ------------------------------------

if __name__ == "__main__":
    N, C, L = 2, 8, 16
    key = jax.random.PRNGKey(0)
    k_x, k_w1, k_b1, k_w2, k_b2 = jax.random.split(key, 5)

    x = jax.random.normal(k_x, (N, C, L), jnp.float32)

    # Deterministic params; conv weights ~ U(-1/sqrt(fan_in), 1/sqrt(fan_in))
    bound = 1.0 / (C * KERNEL_SIZE) ** 0.5
    w1 = jax.random.uniform(k_w1, (C, C, KERNEL_SIZE), jnp.float32, -bound, bound)
    b1 = jax.random.uniform(k_b1, (C,), jnp.float32, -bound, bound)
    w2 = jax.random.uniform(k_w2, (C, C, KERNEL_SIZE), jnp.float32, -bound, bound)
    b2 = jax.random.uniform(k_b2, (C,), jnp.float32, -bound, bound)
    g1, be1 = jnp.ones((C,), jnp.float32), jnp.zeros((C,), jnp.float32)
    g2, be2 = jnp.ones((C,), jnp.float32), jnp.zeros((C,), jnp.float32)
    params = (w1, b1, g1, be1, w2, b2, g2, be2)

    out = jax.block_until_ready(residual_block(x, params))
    ref = residual_block_reference(x, params)

    assert out.shape == (N, C, L)
    assert jnp.allclose(out, ref, atol=1e-4, rtol=1e-4)
    print("KERNEL_OK")
</pallas_src>

<mosaic_0001>
module attributes {stable_mosaic.version = 11 : i64} {
  func.func @_conv_bn_relu_kernel(%arg0: i32, %arg1: memref<8x256xf32, #tpu.memory_space<vmem>>, %arg2: memref<8x24xf32, #tpu.memory_space<vmem>>, %arg3: memref<8x1xf32, #tpu.memory_space<vmem>>, %arg4: memref<8x1xf32, #tpu.memory_space<vmem>>, %arg5: memref<8x1xf32, #tpu.memory_space<vmem>>, %arg6: memref<1x256xf32, #tpu.memory_space<vmem>>, %arg7: memref<8x256xf32, #tpu.memory_space<vmem>>) attributes {dimension_semantics = [#tpu.dimension_semantics<parallel>], iteration_bounds = array<i64: 1>, scalar_prefetch = 0 : i64, scratch_operands = 0 : i64, tpu.core_type = #tpu.core_type<tc>, window_params = [{pipeline_mode = #tpu.pipeline_mode<synchronous>, transform_indices = @transform_0, window_bounds = array<i64: 8, 256>}, {transform_indices = @transform_1, window_bounds = array<i64: 8, 24>}, {transform_indices = @transform_2, window_bounds = array<i64: 8, 1>}, {transform_indices = @transform_3, window_bounds = array<i64: 8, 1>}, {transform_indices = @transform_4, window_bounds = array<i64: 8, 1>}, {pipeline_mode = #tpu.pipeline_mode<synchronous>, transform_indices = @transform_5, window_bounds = array<i64: 1, 256>}, {transform_indices = @transform_6, window_bounds = array<i64: 8, 256>}]} {
    %c0 = arith.constant 0 : index
    %c0_0 = arith.constant 0 : index
    %0 = vector.load %arg6[%c0, %c0_0] : memref<1x256xf32, #tpu.memory_space<vmem>>, vector<1x256xf32>
    %c0_1 = arith.constant 0 : index
    %c0_2 = arith.constant 0 : index
    %1 = vector.load %arg1[%c0_1, %c0_2] : memref<8x256xf32, #tpu.memory_space<vmem>>, vector<8x256xf32>
    %c0_3 = arith.constant 0 : index
    %c0_4 = arith.constant 0 : index
    %2 = vector.load %arg2[%c0_3, %c0_4] : memref<8x24xf32, #tpu.memory_space<vmem>>, vector<8x24xf32>
    %c0_5 = arith.constant 0 : index
    %c0_6 = arith.constant 0 : index
    %3 = vector.load %arg3[%c0_5, %c0_6] : memref<8x1xf32, #tpu.memory_space<vmem>>, vector<8x1xf32>
    %c0_7 = arith.constant 0 : index
    %c0_8 = arith.constant 0 : index
    %4 = vector.load %arg4[%c0_7, %c0_8] : memref<8x1xf32, #tpu.memory_space<vmem>>, vector<8x1xf32>
    %c0_9 = arith.constant 0 : index
    %c0_10 = arith.constant 0 : index
    %5 = vector.load %arg5[%c0_9, %c0_10] : memref<8x1xf32, #tpu.memory_space<vmem>>, vector<8x1xf32>
    %c1_i32 = arith.constant 1 : i32
    %6 = tpu.dynamic_rotate %1 by %c1_i32 dim 1 : vector<8x256xf32>, i32 -> vector<8x256xf32>
    %c255_i32 = arith.constant 255 : i32
    %7 = tpu.dynamic_rotate %1 by %c255_i32 dim 1 : vector<8x256xf32>, i32 -> vector<8x256xf32>
    %8 = tpu.concatenate %6, %1, %7 in 0 : vector<8x256xf32>, vector<8x256xf32>, vector<8x256xf32> -> vector<24x256xf32>
    %cst = arith.constant dense<0.000000e+00> : vector<8x256xf32>
    %9 = tpu.matmul %2, %8, %cst {dimension_numbers = #tpu.dot_dimension_numbers<[1], [0], [0], [1], [0, 0, 1, 1], [], []>} : vector<8x24xf32>, vector<24x256xf32>, vector<8x256xf32> -> vector<8x256xf32>
    %10 = vector.broadcast %3 : vector<8x1xf32> to vector<8x256xf32>
    %11 = arith.addf %9, %10 : vector<8x256xf32>
    %12 = vector.broadcast %0 : vector<1x256xf32> to vector<8x256xf32>
    %13 = arith.mulf %11, %12 : vector<8x256xf32>
    %cst_11 = arith.constant dense<0.000000e+00> : vector<8xf32>
    %14 = vector.multi_reduction <add>, %13, %cst_11 [1] : vector<8x256xf32> to vector<8xf32>
    %15 = vector.shape_cast %14 : vector<8xf32> to vector<8x1xf32>
    %16 = arith.mulf %13, %13 : vector<8x256xf32>
    %cst_12 = arith.constant dense<0.000000e+00> : vector<8xf32>
    %17 = vector.multi_reduction <add>, %16, %cst_12 [1] : vector<8x256xf32> to vector<8xf32>
    %18 = vector.shape_cast %17 : vector<8xf32> to vector<8x1xf32>
    %cst_13 = arith.constant 3.125000e-02 : f32
    %19 = vector.broadcast %cst_13 : f32 to vector<8x1xf32>
    %20 = arith.mulf %15, %19 : vector<8x1xf32>
    %cst_14 = arith.constant 3.125000e-02 : f32
    %21 = vector.broadcast %cst_14 : f32 to vector<8x1xf32>
    %22 = arith.mulf %18, %21 : vector<8x1xf32>
    %23 = arith.mulf %20, %20 : vector<8x1xf32>
    %24 = arith.subf %22, %23 : vector<8x1xf32>
    %cst_15 = arith.constant 9.99999974E-6 : f32
    %25 = vector.broadcast %cst_15 : f32 to vector<8x1xf32>
    %26 = arith.addf %24, %25 : vector<8x1xf32>
    %27 = math.rsqrt %26 : vector<8x1xf32>
    %28 = vector.broadcast %20 : vector<8x1xf32> to vector<8x256xf32>
    %29 = arith.subf %11, %28 : vector<8x256xf32>
    %30 = vector.broadcast %27 : vector<8x1xf32> to vector<8x256xf32>
    %31 = arith.mulf %29, %30 : vector<8x256xf32>
    %32 = vector.broadcast %4 : vector<8x1xf32> to vector<8x256xf32>
    %33 = arith.mulf %31, %32 : vector<8x256xf32>
    %34 = vector.broadcast %5 : vector<8x1xf32> to vector<8x256xf32>
    %35 = arith.addf %33, %34 : vector<8x256xf32>
    %cst_16 = arith.constant 0.000000e+00 : f32
    %36 = vector.broadcast %cst_16 : f32 to vector<8x256xf32>
    %37 = arith.maximumf %35, %36 : vector<8x256xf32>
    %38 = vector.broadcast %0 : vector<1x256xf32> to vector<8x256xf32>
    %39 = arith.mulf %37, %38 : vector<8x256xf32>
    %c0_17 = arith.constant 0 : index
    %c0_18 = arith.constant 0 : index
    %40 = vector.load %arg7[%c0_17, %c0_18] : memref<8x256xf32, #tpu.memory_space<vmem>>, vector<8x256xf32>
    tpu.vector_store %arg7[%c0_17, %c0_18], %39 {strides = array<i32>} : memref<8x256xf32, #tpu.memory_space<vmem>>, vector<8x256xf32>,
    return
  }
  func.func @transform_0(%arg0: i32) -> (i32, i32) {
    %c0_i32 = arith.constant 0 : i32
    %c0_i32_0 = arith.constant 0 : i32
    %c0_i32_1 = arith.constant 0 : i32
    return %c0_i32, %c0_i32_0 : i32, i32
  }
  func.func @transform_1(%arg0: i32) -> (i32, i32) {
    %c0_i32 = arith.constant 0 : i32
    %c0_i32_0 = arith.constant 0 : i32
    return %arg0, %c0_i32 : i32, i32
  }
  func.func @transform_2(%arg0: i32) -> (i32, i32) {
    %c0_i32 = arith.constant 0 : i32
    %c0_i32_0 = arith.constant 0 : i32
    return %arg0, %c0_i32 : i32, i32
  }
  func.func @transform_3(%arg0: i32) -> (i32, i32) {
    %c0_i32 = arith.constant 0 : i32
    %c0_i32_0 = arith.constant 0 : i32
    return %arg0, %c0_i32 : i32, i32
  }
  func.func @transform_4(%arg0: i32) -> (i32, i32) {
    %c0_i32 = arith.constant 0 : i32
    %c0_i32_0 = arith.constant 0 : i32
    return %arg0, %c0_i32 : i32, i32
  }
  func.func @transform_5(%arg0: i32) -> (i32, i32) {
    %c0_i32 = arith.constant 0 : i32
    %c0_i32_0 = arith.constant 0 : i32
    %c0_i32_1 = arith.constant 0 : i32
    return %c0_i32, %c0_i32_0 : i32, i32
  }
  func.func @transform_6(%arg0: i32) -> (i32, i32) {
    %c0_i32 = arith.constant 0 : i32
    %c0_i32_0 = arith.constant 0 : i32
    return %arg0, %c0_i32 : i32, i32
  }
}

</mosaic_0001>

<bundles_post_ra>
// kernel: tpu_custom_call.1
= control target key start
LH: loop header
LB: loop body
LE: loop exit
PB: predicated region body
PF: predicated region fallthrough
CT: control target
= control target key end

     0   :  { %s235_s25 = smov 127   ;;  %v236_v3 = vmov 0.0   ;;  %s308_s0 = inlined_call_operand.vmem [shape: f32[8,256], index: 0, kind: input, shape index: {}]   ;;  %s309_s1 = inlined_call_operand.vmem [shape: f32[8,24], index: 1, kind: input, shape index: {}]   ;;  %s310_s2 = inlined_call_operand.vmem [shape: f32[8,1], index: 2, kind: input, shape index: {}]   ;;  %s311_s3 = inlined_call_operand.vmem [shape: f32[8,1], index: 3, kind: input, shape index: {}]   ;;  %s312_s4 = inlined_call_operand.vmem [shape: f32[8,1], index: 4, kind: input, shape index: {}]   ;;  %s313_s5 = inlined_call_operand.vmem [shape: f32[1,256], index: 5, kind: input, shape index: {}]   ;;  %s314_s6 = inlined_call_operand.hbm [shape: f32[8,256], index: 6, kind: output, shape index: {}]  }
   0x1   :  { %v25_v0 = vld [vmem:[%s308_s0] sm:$0xff]  ;;  %v26_v1 = vld [vmem:[%s308_s0 + $0x8] sm:$0xff]  ;;  %120 = vmatprep.mubr.f32.mxu0 %v236_v3 }
   0x2   :  { %v202_v2 = vpack.i.bf16 %v26_v1, %v25_v0  ;;  %42 = vrot.lane.b32.xlu1 %v26_v1, %s235_s25 }
   0x3   :  { %11 = vsyncpa [#allocation3], 0  ;;  %v237_v4 = vmov 0   ;;  %v28_v5 = vld [vmem:[%s310_s2] sm:$0xff]  ;;  %s238_s28 = smov 1   ;;  %v35_v6 = vlaneseq  ;;  %vm52_vm2 = vcmask 195584  }
   0x4   :  { %207 = vset.pattern.permute.xlu1 %v237_v4  ;;  %208 = vset.pattern.permute.xlu0 %v237_v4  ;;  %v27_v19 = vld [vmem:[%s309_s1] sm:$0xff] }
   0x5   :  { %203 = vrot.lane.b32.xlu0 %v202_v2, %s238_s28  ;;  %v36_v7 = vand.u32 127, %v35_v6  ;;  %v129_v20 = vshrl.u32 %v35_v6, 7  ;;  %v24_v22 = vld [vmem:[%s313_s5] sm:$0x3] }
   0x6   :  { %49 = vperm.xlu1 %207, %v28_v5   ;;  %v30_v37 = vld [vmem:[%s312_s4] sm:$0xff] }
   0x7   :  { %vm37_vm0 = vcmp.lt.s32.totalorder %v36_v7, 1  ;;  %vm44_vm1 = vcmp.lt.s32.totalorder %v36_v7, 127  ;;  %v130_v21 = vsub.s32 0, %v129_v20  ;;  %v134_v23 = vsub.s32 1, %v129_v20  ;;  %v29_v38 = vld [vmem:[%s311_s3] sm:$0xff]  ;;  %s239_s3 = smov [#allocation2]  }
   0x8   :  { %s184_s4 = sshll.u32 %s239_s3, 4  ;;  %s185_s4 = int_to_ptr.vmem [resolvable:$true] %s184_s4 }
   0x9   :  { %40 = vrot.lane.b32.xlu0 %v25_v0, %s235_s25  ;;  %v131_v25 = vrot.slane %v24_v22, %v130_v21  ;;  %v135_v27 = vrot.slane %v24_v22, %v134_v23  ;;  %s211_s9 = scalar_lea.vmem %s185_s4, 256  ;;  %p216_p1 = scmp.lt.s32.totalorder %s185_s4, %s185_s4 }
   0xa   :  { %p212_p0 = scmp.ne.s32.totalorder %s185_s4, %s211_s9  ;;  %p217_p2 = scmp.lt.s32.totalorder %s211_s9, %s211_s9 }
   0xc   :  { %p218_p3 = por %p217_p2, %p216_p1 }
   0xe   :  { %p219_p4 = pnand %p218_p3, %p212_p0 }
  0x74   :  { %v43_v11 = vpop.permute.xlu1 %42 }
  0x77   :  { %v204_v8 = vpop.permute.xlu0 %203 }
  0x78   :  { %v206_v9 = vunpack.i.h.bf16 %v204_v8  ;;  %v205_v10 = vunpack.i.l.bf16 %v204_v8 }
  0x7a   :  { %v38_v12 = vsel %vm37_vm0, %v205_v10, %v206_v9  ;;  %v39_v13 = vsel %vm37_vm0, %v206_v9, %v205_v10 }
  0x7b   :  { %v193_v14 = vpack.c.bf16 %v26_v1, %v38_v12  ;;  %v195_v15 = vpack.c.bf16 %v25_v0, %v39_v13  ;;  %v41_v16 = vpop.permute.xlu0 %40 }
  0x7c   :  { %v46_v17 = vsel %vm44_vm1, %v43_v11, %v41_v16  ;;  %v45_v18 = vsel %vm44_vm1, %v41_v16, %v43_v11 }
  0x7d   :  { %194 = vmatprep.subr.bf16.mxu0 %v193_v14 }
  0x7e   :  { %196 = vmatpush1.bf16.msra.mxu0 %v195_v15 }
  0x7f   :  { %60 = vmatprep.subr.mxu0 %v46_v17 }
  0x82   :  { %61 = vmatpush1.msra.mxu0 %v45_v18 }
  0x83   :  { %192 = vmatmul.mubr.msk.f32.vlgmr.msra.gmra.mrb[0].mxu0 %vm52_vm2, %v27_v19 }
  0x85   :  { %v50_v24 = vpop.permute.xlu1 %49 }
 0x156   :  { %v122_v26 = vpop.f32.mrb[0].mxu0 }
 0x157   :  { %v123_v28 = vadd.f32 %v122_v26, %v50_v24  ;;  %v124_v29 = vpop.f32.mrb[1].mxu0 }
 0x158   :  { %v125_v30 = vadd.f32 %v124_v29, %v50_v24 }
 0x159   :  { %v138_v31 = vmul.f32 %v131_v25, %v123_v28 }
 0x15a   :  { %v139_v32 = vmul.f32 %v135_v27, %v125_v30 }
 0x15b   :  { %v143_v33 = vmul.f32 %v138_v31, %v138_v31 }
 0x15c   :  { %v140_v34 = vadd.f32 %v139_v32, %v138_v31  ;;  %v144_v35 = vmul.f32 %v139_v32, %v139_v32 }
 0x15e   :  { %141 = vadd.xlane.f32.xlu0 %v140_v34  ;;  %v145_v36 = vadd.f32 %v144_v35, %v143_v33 }
 0x160   :  { %146 = vadd.xlane.f32.xlu1 %v145_v36 }
 0x171   :  { %167 = vperm.xlu1 %207, %v30_v37  }
 0x174   :  { %160 = vperm.xlu0 %208, %v29_v38  }
 0x1eb   :  { %v142_v39 = vpop.xlane.xlu0 %141 }
 0x1ec   :  { %v148_v40 = vmul.f32 0.03125, %v142_v39 }
 0x1ed   :  { %v147_v41 = vpop.xlane.xlu1 %146 }
 0x1ee   :  { %v149_v42 = vmul.f32 0.03125, %v147_v41  ;;  %v150_v43 = vmul.f32 %v148_v40, %v148_v40  ;;  %v154_v46 = vsub.f32 %v123_v28, %v148_v40  ;;  %v155_v47 = vsub.f32 %v125_v30, %v148_v40 }
 0x1f0   :  { %v151_v44 = vsub.f32 %v149_v42, %v150_v43 }
 0x1f1   :  { %v168_v54 = vpop.permute.xlu1 %167 }
 0x1f2   :  { %v152_v45 = vadd.f32 1e-05, %v151_v44 }
 0x1f3   :  { %v161_v49 = vpop.permute.xlu0 %160 }
 0x1f4   :  { %209 = vrsqrt.f32 %v152_v45 }
 0x1fe   :  { %v210_v48 = vpop.eup %209 }
 0x1ff   :  { %v156_v50 = vmul.f32 %v210_v48, %v154_v46  ;;  %v157_v51 = vmul.f32 %v210_v48, %v155_v47 }
 0x201   :  { %v163_v52 = vmul.f32 %v161_v49, %v156_v50  ;;  %v164_v53 = vmul.f32 %v161_v49, %v157_v51 }
 0x203   :  { %v170_v55 = vadd.f32 %v168_v54, %v163_v52  ;;  %v171_v56 = vadd.f32 %v168_v54, %v164_v53 }
 0x205   :  { %v172_v57 = vmax.f32 %v170_v55, 0.0  ;;  %v173_v58 = vmax.f32 %v171_v56, 0.0 }
 0x207   :  { %v174_v59 = vmul.f32 %v172_v57, %v131_v25  ;;  %v175_v60 = vmul.f32 %v173_v58, %v135_v27 }
 0x209   :  { %176 = vst [vmem:[#allocation2] sm:$0xff] %v174_v59  ;;  %177 = vst [vmem:[#allocation2 + $0x8] sm:$0xff] %v175_v60 }
 0x20a   :  { %222 = shalt.err (!%p219_p4)
}
 0x20b   :  { %s223_s12 = scalar_lea.hbm %s314_s6, 256 }
 0x20c   :  { %p224_p5 = scmp.ne.s32.totalorder %s314_s6, %s223_s12  ;;  %p227_p6 = scmp.lt.u32.totalorder %s223_s12, %s314_s6 }
 0x20e   :  { %p229_p7 = pnand %p227_p6, %p224_p5 }
 0x210   :  { %232 = shalt.err (!%p229_p7)
}
 0x211   :  { %187 = dma.vmem_to_hbm [thread:$0]  %s185_s4, 256, %s314_s6, [#allocation3]  }
 0x212   :  { %233 = dma.done.wait [#allocation3], 256  }
 0x213   :  { %234 = vsyncadd [#allocation3], 4294967040 }
 0x214   :  { %191 = vsyncpa [#allocation3], 1 }

</bundles_post_ra>
